<compile_context>
chip_gen: v5e
topology: v5e:2x2
jax: 0.10.0
libtpu: 0.0.40
codegen_flags: <defaults>
</compile_context>

<pallas_src>
import jax
import jax.numpy as jnp
from jax.experimental import pallas as pl
from jax.experimental.pallas import tpu as pltpu


_SQRT_HALF = 0.7071067811865476


def _detect_vmem_capacity_bytes():
    try:
        return int(pltpu.get_tpu_info().vmem_capacity_bytes)
    except Exception:
        return 64 * 1024 * 1024  # conservative default: v7x per-core VMEM


_VMEM_CAP = _detect_vmem_capacity_bytes()


def _cdiv(a, b):
    return -(-a // b)


def _round_up(x, m):
    return ((x + m - 1) // m) * m


# ----------------------------------------------------------------------------
# In-kernel math (exact erf-based GELU, f32)
# ----------------------------------------------------------------------------
def _erf_f32(x):
    """erf via Abramowitz & Stegun 7.1.26 (|abs err| < ~4e-4 with approx rcp).

    Uses only mul/add/max/where + EUP exp/reciprocal so it lowers to VPU + EUP.
    """
    ax = jnp.maximum(x, -x)
    # EUP reciprocal (approx) instead of a VALU divide.
    t = pl.reciprocal(1.0 + 0.3275911 * ax, approx=True)
    poly = ((((1.061405429 * t - 1.453152027) * t + 1.421413741) * t
             - 0.284496736) * t + 0.254829592) * t
    y = 1.0 - poly * jnp.exp(-ax * ax)
    return jnp.where(x >= 0.0, y, -y)


def _gelu_exact(x):
    """torch.nn.GELU() default (erf form), computed in f32."""
    return 0.5 * x * (1.0 + _erf_f32(x * _SQRT_HALF))


# ----------------------------------------------------------------------------
# Kernels
# ----------------------------------------------------------------------------
def _mlp_kernel_resident(x_ref, w1_ref, b1_ref, w2_ref, b2_ref, o_ref):
    # x_ref : (tm, C_in)      w1_ref: (C_in, C_hid)   b1_ref: (1, C_hid) f32
    # w2_ref: (C_hid, C_out)  b2_ref: (1, C_out) f32  o_ref : (tm, C_out)
    h = jnp.dot(x_ref[...], w1_ref[...], preferred_element_type=jnp.float32)
    h = _gelu_exact(h + b1_ref[...])
    # TODO(synk): training-mode dropout (p > 0) would need pltpu.prng_seed +
    # pltpu.prng_random_bits; with the module default p=0.0 / eval it is identity.
    o = jnp.dot(h.astype(w2_ref.dtype), w2_ref[...],
                preferred_element_type=jnp.float32)
    o_ref[...] = (o + b2_ref[...]).astype(o_ref.dtype)


def _mlp_kernel_hid_tiled(x_ref, w1_ref, b1_ref, w2_ref, b2_ref, o_ref, acc_ref):
    # Streamed-hidden variant: W1 column block (C_in, t_hid), W2 row block
    # (t_hid, C_out), accumulate into f32 scratch, store on the last hid block.
    k = pl.program_id(1)

    @pl.when(k == 0)
    def _():
        acc_ref[...] = jnp.zeros_like(acc_ref)

    h = jnp.dot(x_ref[...], w1_ref[...], preferred_element_type=jnp.float32)
    h = _gelu_exact(h + b1_ref[...])
    acc_ref[...] += jnp.dot(h.astype(w2_ref.dtype), w2_ref[...],
                            preferred_element_type=jnp.float32)

    @pl.when(k == pl.num_programs(1) - 1)
    def _():
        o_ref[...] = (acc_ref[...] + b2_ref[...]).astype(o_ref.dtype)


# ----------------------------------------------------------------------------
# VMEM footprint models + tiling choices
# ----------------------------------------------------------------------------
def _resident_vmem_bytes(tm, in_f, hid_f, out_f, x_b, w_b, o_b, weight_bufs):
    weights = weight_bufs * (in_f * hid_f + hid_f * out_f) * w_b
    biases = weight_bufs * (hid_f + out_f) * 4
    x_tiles = 2 * tm * in_f * x_b          # double-buffered input tiles
    o_tiles = 2 * tm * out_f * o_b         # double-buffered output tiles
    hidden = 2 * tm * hid_f * 4            # f32 h + GELU temporaries (rough)
    return weights + biases + x_tiles + o_tiles + hidden


def _hid_tiled_vmem_bytes(tm, t_hid, in_f, out_f, x_b, w_b, o_b):
    x_tiles = 2 * tm * in_f * x_b
    w1_blk = 2 * in_f * t_hid * w_b
    w2_blk = 2 * t_hid * out_f * w_b
    biases = 2 * (t_hid + out_f) * 4
    o_tiles = 2 * tm * out_f * o_b
    acc = tm * out_f * 4
    hidden = 2 * tm * t_hid * 4
    return x_tiles + w1_blk + w2_blk + biases + o_tiles + acc + hidden


def _pick_tm(m, tm_req):
    """Row tile: big enough to amortize per-grid-step overhead, small enough to
    give >= 2 'parallel' blocks so both v7x TensorCores get work."""
    if m <= 256:
        return m                               # single full-extent block
    tm = _round_up(min(tm_req, m), 8)
    if _cdiv(m, tm) < 2:                       # split mid-sized batches for megacore
        tm = _round_up(_cdiv(m, 2), 8)
    return tm


# ----------------------------------------------------------------------------
# pallas_call builders
# ----------------------------------------------------------------------------
def _build_resident_call(m, in_f, hid_f, out_f, tm, out_dtype, vmem_limit,
                         single_buffer_weights, cost):
    wkw = dict(pipeline_mode=pl.Buffered(1)) if single_buffer_weights else {}
    return pl.pallas_call(
        _mlp_kernel_resident,
        out_shape=jax.ShapeDtypeStruct((m, out_f), out_dtype),
        grid_spec=pltpu.PrefetchScalarGridSpec(
            num_scalar_prefetch=0,
            grid=(_cdiv(m, tm),),
            in_specs=[
                pl.BlockSpec((tm, in_f), lambda i: (i, 0)),
                pl.BlockSpec((in_f, hid_f), lambda i: (0, 0), **wkw),  # resident W1
                pl.BlockSpec((1, hid_f), lambda i: (0, 0), **wkw),     # resident b1
                pl.BlockSpec((hid_f, out_f), lambda i: (0, 0), **wkw),  # resident W2
                pl.BlockSpec((1, out_f), lambda i: (0, 0), **wkw),     # resident b2
            ],
            out_specs=pl.BlockSpec((tm, out_f), lambda i: (i, 0)),
        ),
        compiler_params=pltpu.CompilerParams(
            dimension_semantics=("parallel",),
            vmem_limit_bytes=vmem_limit,
        ),
        cost_estimate=cost,
    )


def _build_hid_tiled_call(m, in_f, hid_f, out_f, tm, t_hid, out_dtype,
                          vmem_limit, cost):
    return pl.pallas_call(
        _mlp_kernel_hid_tiled,
        out_shape=jax.ShapeDtypeStruct((m, out_f), out_dtype),
        grid_spec=pltpu.PrefetchScalarGridSpec(
            num_scalar_prefetch=0,
            grid=(_cdiv(m, tm), hid_f // t_hid),
            in_specs=[
                pl.BlockSpec((tm, in_f), lambda i, k: (i, 0)),
                pl.BlockSpec((in_f, t_hid), lambda i, k: (0, k)),   # stream W1 cols
                pl.BlockSpec((1, t_hid), lambda i, k: (0, k)),
                pl.BlockSpec((t_hid, out_f), lambda i, k: (k, 0)),  # stream W2 rows
                pl.BlockSpec((1, out_f), lambda i, k: (0, 0)),
            ],
            out_specs=pl.BlockSpec((tm, out_f), lambda i, k: (i, 0)),
            scratch_shapes=[pltpu.VMEM((tm, out_f), jnp.float32)],
        ),
        compiler_params=pltpu.CompilerParams(
            dimension_semantics=("parallel", "arbitrary"),
            vmem_limit_bytes=vmem_limit,
        ),
        cost_estimate=cost,
    )


# ----------------------------------------------------------------------------
# Public wrapper
# ----------------------------------------------------------------------------
def mlp_forward(x, w1, b1, w2, b2, *, drop=0.0, training=False, tm=512,
                force_hid_tiled=False, t_hid=None):
    """Mlp.forward.  x: (..., in_features).

    Weights are stored pre-transposed (no per-call weight.T):
      w1: (in_features, hidden_features), w2: (hidden_features, out_features).
    Matmul operands run at the weights' dtype (use bf16 weights for full MXU
    rate); accumulation is f32; GELU is the exact erf form (torch default).
    """
    if drop > 0.0 and training:
        # TODO(synk): training-mode dropout (p > 0) needs pltpu.prng_seed +
        # pltpu.prng_random_bits; eval / the module default p=0.0 is identity.
        raise NotImplementedError("training-mode dropout (p > 0) not implemented")

    lead = x.shape[:-1]
    in_f = x.shape[-1]
    hid_f = w1.shape[1]
    out_f = w2.shape[1]
    out_dtype = x.dtype
    compute_dtype = w1.dtype

    x2 = x.reshape(-1, in_f).astype(compute_dtype)
    m = x2.shape[0]

    b1r = b1.reshape(1, hid_f).astype(jnp.float32)
    b2r = b2.reshape(1, out_f).astype(jnp.float32)

    x_b = x2.dtype.itemsize
    w_b = w1.dtype.itemsize
    o_b = jnp.dtype(out_dtype).itemsize

    cost = pl.CostEstimate(
        flops=2 * m * hid_f * (in_f + out_f),
        transcendentals=m * hid_f,
        bytes_accessed=(m * in_f * x_b + m * out_f * o_b
                        + (in_f * hid_f + hid_f * out_f) * w_b
                        + (hid_f + out_f) * 4),
    )

    budget = int(0.65 * _VMEM_CAP)     # headroom for compiler-internal scratch
    tm_eff = _pick_tm(m, tm)

    # Weight-residency decision is made conservatively assuming double-buffered
    # weights; pl.Buffered(1) (if accepted) is pure extra headroom on top.
    weights_bytes_2buf = 2 * ((in_f * hid_f + hid_f * out_f) * w_b
                              + (hid_f + out_f) * 4)
    use_resident = (weights_bytes_2buf <= budget // 2) and not force_hid_tiled

    if use_resident:
        # Shrink the row tile until the full footprint fits (on v7x's 64 MiB this
        # typically lands on tm=256 for large hidden dims; v5e/v6e keep 512).
        while tm_eff > 256 and _resident_vmem_bytes(
                tm_eff, in_f, hid_f, out_f, x_b, w_b, o_b, 2) > budget:
            tm_eff = _round_up(tm_eff // 2, 8)
        est = _resident_vmem_bytes(tm_eff, in_f, hid_f, out_f, x_b, w_b, o_b, 2)
        vmem_limit = min(max(int(1.5 * est) + (2 << 20), 32 << 20),
                         int(0.9 * _VMEM_CAP))
        try:
            call = _build_resident_call(m, in_f, hid_f, out_f, tm_eff, out_dtype,
                                        vmem_limit, True, cost)
            out = call(x2, w1, b1r, w2, b2r)
        except Exception:
            # Installed Pallas may reject pl.Buffered(1); default buffering still
            # fits because the residency decision above assumed 2 buffers.
            call = _build_resident_call(m, in_f, hid_f, out_f, tm_eff, out_dtype,
                                        vmem_limit, False, cost)
            out = call(x2, w1, b1r, w2, b2r)
    else:
        # Stream the hidden dimension: VMEM bounded independently of hid_f.
        if t_hid is None:
            t_hid = hid_f  # fallback (only hit for odd hid_f; may still be large)
            for cand in (1024, 512, 256, 128):
                if hid_f % cand == 0 and _hid_tiled_vmem_bytes(
                        tm_eff, cand, in_f, out_f, x_b, w_b, o_b) <= budget:
                    t_hid = cand
                    break
        assert hid_f % t_hid == 0, (hid_f, t_hid)
        while tm_eff > 256 and _hid_tiled_vmem_bytes(
                tm_eff, t_hid, in_f, out_f, x_b, w_b, o_b) > budget:
            tm_eff = _round_up(tm_eff // 2, 8)
        est = _hid_tiled_vmem_bytes(tm_eff, t_hid, in_f, out_f, x_b, w_b, o_b)
        vmem_limit = min(max(int(1.5 * est) + (2 << 20), 32 << 20),
                         int(0.9 * _VMEM_CAP))
        call = _build_hid_tiled_call(m, in_f, hid_f, out_f, tm_eff, t_hid,
                                     out_dtype, vmem_limit, cost)
        out = call(x2, w1, b1r, w2, b2r)

    return out.reshape(*lead, out_f)


def init_mlp_params(key, in_features, hidden_features=None, out_features=None,
                    dtype=jnp.bfloat16):
    """torch.nn.Linear default init (U(+-1/sqrt(fan_in))); weights stored
    pre-transposed (fan_in, fan_out) in `dtype` (bf16 for full MXU rate),
    biases kept f32."""
    out_features = out_features or in_features
    hidden_features = hidden_features or in_features
    k1, k2, k3, k4 = jax.random.split(key, 4)

    def linear(kw, kb, fan_in, fan_out):
        bound = 1.0 / (fan_in ** 0.5)
        w = jax.random.uniform(kw, (fan_in, fan_out), minval=-bound, maxval=bound,
                               dtype=jnp.float32).astype(dtype)
        b = jax.random.uniform(kb, (fan_out,), minval=-bound, maxval=bound,
                               dtype=jnp.float32)
        return w, b

    w1, b1 = linear(k1, k2, in_features, hidden_features)
    w2, b2 = linear(k3, k4, hidden_features, out_features)
    return w1, b1, w2, b2


if __name__ == "__main__":
    key = jax.random.PRNGKey(0)
    k_x, k_p1, k_p2 = jax.random.split(key, 3)

    def ref_mlp(x, w1, b1, w2, b2):
        cd = w1.dtype
        h = jnp.dot(x.astype(cd), w1, preferred_element_type=jnp.float32)
        h = jax.nn.gelu(h + b1.astype(jnp.float32), approximate=False)
        o = jnp.dot(h.astype(cd), w2, preferred_element_type=jnp.float32)
        return (o + b2.astype(jnp.float32)).astype(x.dtype)

    # --- Test 1: small Mlp, resident-weight path (bf16 operands, f32 accum) ---
    batch, seq = 2, 8
    in_f, hid_f, out_f = 32, 64, 32
    x = jax.random.normal(k_x, (batch, seq, in_f), dtype=jnp.float32)
    w1, b1, w2, b2 = init_mlp_params(k_p1, in_f, hid_f, out_f, dtype=jnp.bfloat16)

    out = jax.block_until_ready(mlp_forward(x, w1, b1, w2, b2))
    ref = ref_mlp(x, w1, b1, w2, b2)
    assert out.shape == (batch, seq, out_f), out.shape
    err1 = float(jnp.max(jnp.abs(out - ref)))
    assert jnp.allclose(out, ref, atol=2e-2, rtol=2e-2), err1

    # --- Test 2: force the hidden-dim-streamed accumulator path (big-MLP fallback) ---
    in_f2, hid_f2, out_f2 = 32, 256, 32
    x2 = jax.random.normal(k_x, (batch, seq, in_f2), dtype=jnp.float32)
    w1b, b1b, w2b, b2b = init_mlp_params(k_p2, in_f2, hid_f2, out_f2,
                                         dtype=jnp.bfloat16)
    out2 = jax.block_until_ready(
        mlp_forward(x2, w1b, b1b, w2b, b2b, force_hid_tiled=True, t_hid=128))
    ref2 = ref_mlp(x2, w1b, b1b, w2b, b2b)
    assert out2.shape == (batch, seq, out_f2), out2.shape
    err2 = float(jnp.max(jnp.abs(out2 - ref2)))
    assert jnp.allclose(out2, ref2, atol=2e-2, rtol=2e-2), err2

    print("KERNEL_OK")
</pallas_src>

<mosaic_0001>
module attributes {stable_mosaic.version = 11 : i64} {
  func.func @_mlp_kernel_resident(%arg0: i32, %arg1: memref<16x32xbf16, #tpu.memory_space<vmem>>, %arg2: memref<32x64xbf16, #tpu.memory_space<vmem>>, %arg3: memref<1x64xf32, #tpu.memory_space<vmem>>, %arg4: memref<64x32xbf16, #tpu.memory_space<vmem>>, %arg5: memref<1x32xf32, #tpu.memory_space<vmem>>, %arg6: memref<16x32xf32, #tpu.memory_space<vmem>>) attributes {dimension_semantics = [#tpu.dimension_semantics<parallel>], iteration_bounds = array<i64: 1>, scalar_prefetch = 0 : i64, scratch_operands = 0 : i64, tpu.core_type = #tpu.core_type<tc>, window_params = [{transform_indices = @transform_0, window_bounds = array<i64: 16, 32>}, {pipeline_mode = #tpu.pipeline_mode<synchronous>, transform_indices = @transform_1, window_bounds = array<i64: 32, 64>}, {pipeline_mode = #tpu.pipeline_mode<synchronous>, transform_indices = @transform_2, window_bounds = array<i64: 1, 64>}, {pipeline_mode = #tpu.pipeline_mode<synchronous>, transform_indices = @transform_3, window_bounds = array<i64: 64, 32>}, {pipeline_mode = #tpu.pipeline_mode<synchronous>, transform_indices = @transform_4, window_bounds = array<i64: 1, 32>}, {transform_indices = @transform_5, window_bounds = array<i64: 16, 32>}]} {
    %c0 = arith.constant 0 : index
    %c0_0 = arith.constant 0 : index
    %0 = vector.load %arg1[%c0, %c0_0] : memref<16x32xbf16, #tpu.memory_space<vmem>>, vector<16x32xbf16>
    %c0_1 = arith.constant 0 : index
    %c0_2 = arith.constant 0 : index
    %1 = vector.load %arg2[%c0_1, %c0_2] : memref<32x64xbf16, #tpu.memory_space<vmem>>, vector<32x64xbf16>
    %cst = arith.constant dense<0.000000e+00> : vector<16x64xf32>
    %2 = tpu.matmul %0, %1, %cst {dimension_numbers = #tpu.dot_dimension_numbers<[1], [0], [0], [1], [0, 0, 1, 1], [], []>} : vector<16x32xbf16>, vector<32x64xbf16>, vector<16x64xf32> -> vector<16x64xf32>
    %c0_3 = arith.constant 0 : index
    %c0_4 = arith.constant 0 : index
    %3 = vector.load %arg3[%c0_3, %c0_4] : memref<1x64xf32, #tpu.memory_space<vmem>>, vector<1x64xf32>
    %4 = vector.broadcast %3 : vector<1x64xf32> to vector<16x64xf32>
    %5 = arith.addf %2, %4 : vector<16x64xf32>
    %cst_5 = arith.constant 5.000000e-01 : f32
    %6 = vector.broadcast %cst_5 : f32 to vector<16x64xf32>
    %7 = arith.mulf %6, %5 : vector<16x64xf32>
    %cst_6 = arith.constant 0.707106769 : f32
    %8 = vector.broadcast %cst_6 : f32 to vector<16x64xf32>
    %9 = arith.mulf %5, %8 : vector<16x64xf32>
    %cst_7 = arith.constant 0.000000e+00 : f32
    %10 = vector.broadcast %cst_7 : f32 to vector<16x64xf32>
    %11 = arith.subf %10, %9 : vector<16x64xf32>
    %12 = arith.maximumf %9, %11 : vector<16x64xf32>
    %cst_8 = arith.constant 0.327591091 : f32
    %13 = vector.broadcast %cst_8 : f32 to vector<16x64xf32>
    %14 = arith.mulf %13, %12 : vector<16x64xf32>
    %cst_9 = arith.constant 1.000000e+00 : f32
    %15 = vector.broadcast %cst_9 : f32 to vector<16x64xf32>
    %16 = arith.addf %15, %14 : vector<16x64xf32>
    %17 = tpu.reciprocal %16 {approx = true} : vector<16x64xf32> -> vector<16x64xf32>
    %cst_10 = arith.constant 1.06140542 : f32
    %18 = vector.broadcast %cst_10 : f32 to vector<16x64xf32>
    %19 = arith.mulf %18, %17 : vector<16x64xf32>
    %cst_11 = arith.constant 1.45315206 : f32
    %20 = vector.broadcast %cst_11 : f32 to vector<16x64xf32>
    %21 = arith.subf %19, %20 : vector<16x64xf32>
    %22 = arith.mulf %21, %17 : vector<16x64xf32>
    %cst_12 = arith.constant 1.42141378 : f32
    %23 = vector.broadcast %cst_12 : f32 to vector<16x64xf32>
    %24 = arith.addf %22, %23 : vector<16x64xf32>
    %25 = arith.mulf %24, %17 : vector<16x64xf32>
    %cst_13 = arith.constant 0.284496725 : f32
    %26 = vector.broadcast %cst_13 : f32 to vector<16x64xf32>
    %27 = arith.subf %25, %26 : vector<16x64xf32>
    %28 = arith.mulf %27, %17 : vector<16x64xf32>
    %cst_14 = arith.constant 0.254829586 : f32
    %29 = vector.broadcast %cst_14 : f32 to vector<16x64xf32>
    %30 = arith.addf %28, %29 : vector<16x64xf32>
    %31 = arith.mulf %30, %17 : vector<16x64xf32>
    %cst_15 = arith.constant 0.000000e+00 : f32
    %32 = vector.broadcast %cst_15 : f32 to vector<16x64xf32>
    %33 = arith.subf %32, %12 : vector<16x64xf32>
    %34 = arith.mulf %33, %12 : vector<16x64xf32>
    %35 = math.exp %34 : vector<16x64xf32>
    %36 = arith.mulf %31, %35 : vector<16x64xf32>
    %cst_16 = arith.constant 1.000000e+00 : f32
    %37 = vector.broadcast %cst_16 : f32 to vector<16x64xf32>
    %38 = arith.subf %37, %36 : vector<16x64xf32>
    %cst_17 = arith.constant 0.000000e+00 : f32
    %39 = vector.broadcast %cst_17 : f32 to vector<16x64xf32>
    %40 = arith.cmpf oge, %9, %39 : vector<16x64xf32>
    %cst_18 = arith.constant 0.000000e+00 : f32
    %41 = vector.broadcast %cst_18 : f32 to vector<16x64xf32>
    %42 = arith.subf %41, %38 : vector<16x64xf32>
    %43 = arith.select %40, %38, %42 : vector<16x64xi1>, vector<16x64xf32>
    %cst_19 = arith.constant 1.000000e+00 : f32
    %44 = vector.broadcast %cst_19 : f32 to vector<16x64xf32>
    %45 = arith.addf %44, %43 : vector<16x64xf32>
    %46 = arith.mulf %7, %45 : vector<16x64xf32>
    %47 = arith.truncf %46 : vector<16x64xf32> to vector<16x64xbf16>
    %c0_20 = arith.constant 0 : index
    %c0_21 = arith.constant 0 : index
    %48 = vector.load %arg4[%c0_20, %c0_21] : memref<64x32xbf16, #tpu.memory_space<vmem>>, vector<64x32xbf16>
    %cst_22 = arith.constant dense<0.000000e+00> : vector<16x32xf32>
    %49 = tpu.matmul %47, %48, %cst_22 {dimension_numbers = #tpu.dot_dimension_numbers<[1], [0], [0], [1], [0, 0, 1, 1], [], []>} : vector<16x64xbf16>, vector<64x32xbf16>, vector<16x32xf32> -> vector<16x32xf32>
    %c0_23 = arith.constant 0 : index
    %c0_24 = arith.constant 0 : index
    %50 = vector.load %arg5[%c0_23, %c0_24] : memref<1x32xf32, #tpu.memory_space<vmem>>, vector<1x32xf32>
    %51 = vector.broadcast %50 : vector<1x32xf32> to vector<16x32xf32>
    %52 = arith.addf %49, %51 : vector<16x32xf32>
    %c0_25 = arith.constant 0 : index
    %c0_26 = arith.constant 0 : index
    %53 = vector.load %arg6[%c0_25, %c0_26] : memref<16x32xf32, #tpu.memory_space<vmem>>, vector<16x32xf32>
    tpu.vector_store %arg6[%c0_25, %c0_26], %52 {strides = array<i32>} : memref<16x32xf32, #tpu.memory_space<vmem>>, vector<16x32xf32>,
    return
  }
  func.func @transform_0(%arg0: i32) -> (i32, i32) {
    %c0_i32 = arith.constant 0 : i32
    %c0_i32_0 = arith.constant 0 : i32
    return %arg0, %c0_i32 : i32, i32
  }
  func.func @transform_1(%arg0: i32) -> (i32, i32) {
    %c0_i32 = arith.constant 0 : i32
    %c0_i32_0 = arith.constant 0 : i32
    %c0_i32_1 = arith.constant 0 : i32
    return %c0_i32, %c0_i32_0 : i32, i32
  }
  func.func @transform_2(%arg0: i32) -> (i32, i32) {
    %c0_i32 = arith.constant 0 : i32
    %c0_i32_0 = arith.constant 0 : i32
    %c0_i32_1 = arith.constant 0 : i32
    return %c0_i32, %c0_i32_0 : i32, i32
  }
  func.func @transform_3(%arg0: i32) -> (i32, i32) {
    %c0_i32 = arith.constant 0 : i32
    %c0_i32_0 = arith.constant 0 : i32
    %c0_i32_1 = arith.constant 0 : i32
    return %c0_i32, %c0_i32_0 : i32, i32
  }
  func.func @transform_4(%arg0: i32) -> (i32, i32) {
    %c0_i32 = arith.constant 0 : i32
    %c0_i32_0 = arith.constant 0 : i32
    %c0_i32_1 = arith.constant 0 : i32
    return %c0_i32, %c0_i32_0 : i32, i32
  }
  func.func @transform_5(%arg0: i32) -> (i32, i32) {
    %c0_i32 = arith.constant 0 : i32
    %c0_i32_0 = arith.constant 0 : i32
    return %arg0, %c0_i32 : i32, i32
  }
}

module attributes {stable_mosaic.version = 11 : i64} {
  func.func @_mlp_kernel_resident(%arg0: i32, %arg1: memref<16x32xbf16, #tpu.memory_space<vmem>>, %arg2: memref<32x64xbf16, #tpu.memory_space<vmem>>, %arg3: memref<1x64xf32, #tpu.memory_space<vmem>>, %arg4: memref<64x32xbf16, #tpu.memory_space<vmem>>, %arg5: memref<1x32xf32, #tpu.memory_space<vmem>>, %arg6: memref<16x32xf32, #tpu.memory_space<vmem>>) attributes {dimension_semantics = [#tpu.dimension_semantics<parallel>], iteration_bounds = array<i64: 1>, scalar_prefetch = 0 : i64, scratch_operands = 0 : i64, tpu.core_type = #tpu.core_type<tc>, window_params = [{transform_indices = @transform_0, window_bounds = array<i64: 16, 32>}, {pipeline_mode = #tpu.pipeline_mode<synchronous>, transform_indices = @transform_1, window_bounds = array<i64: 32, 64>}, {pipeline_mode = #tpu.pipeline_mode<synchronous>, transform_indices = @transform_2, window_bounds = array<i64: 1, 64>}, {pipeline_mode = #tpu.pipeline_mode<synchronous>, transform_indices = @transform_3, window_bounds = array<i64: 64, 32>}, {pipeline_mode = #tpu.pipeline_mode<synchronous>, transform_indices = @transform_4, window_bounds = array<i64: 1, 32>}, {transform_indices = @transform_5, window_bounds = array<i64: 16, 32>}]} {
    %c0 = arith.constant 0 : index
    %c0_0 = arith.constant 0 : index
    %0 = vector.load %arg1[%c0, %c0_0] : memref<16x32xbf16, #tpu.memory_space<vmem>>, vector<16x32xbf16>
    %c0_1 = arith.constant 0 : index
    %c0_2 = arith.constant 0 : index
    %1 = vector.load %arg2[%c0_1, %c0_2] : memref<32x64xbf16, #tpu.memory_space<vmem>>, vector<32x64xbf16>
    %cst = arith.constant dense<0.000000e+00> : vector<16x64xf32>
    %2 = tpu.matmul %0, %1, %cst {dimension_numbers = #tpu.dot_dimension_numbers<[1], [0], [0], [1], [0, 0, 1, 1], [], []>} : vector<16x32xbf16>, vector<32x64xbf16>, vector<16x64xf32> -> vector<16x64xf32>
    %c0_3 = arith.constant 0 : index
    %c0_4 = arith.constant 0 : index
    %3 = vector.load %arg3[%c0_3, %c0_4] : memref<1x64xf32, #tpu.memory_space<vmem>>, vector<1x64xf32>
    %4 = vector.broadcast %3 : vector<1x64xf32> to vector<16x64xf32>
    %5 = arith.addf %2, %4 : vector<16x64xf32>
    %cst_5 = arith.constant 5.000000e-01 : f32
    %6 = vector.broadcast %cst_5 : f32 to vector<16x64xf32>
    %7 = arith.mulf %6, %5 : vector<16x64xf32>
    %cst_6 = arith.constant 0.707106769 : f32
    %8 = vector.broadcast %cst_6 : f32 to vector<16x64xf32>
    %9 = arith.mulf %5, %8 : vector<16x64xf32>
    %cst_7 = arith.constant 0.000000e+00 : f32
    %10 = vector.broadcast %cst_7 : f32 to vector<16x64xf32>
    %11 = arith.subf %10, %9 : vector<16x64xf32>
    %12 = arith.maximumf %9, %11 : vector<16x64xf32>
    %cst_8 = arith.constant 0.327591091 : f32
    %13 = vector.broadcast %cst_8 : f32 to vector<16x64xf32>
    %14 = arith.mulf %13, %12 : vector<16x64xf32>
    %cst_9 = arith.constant 1.000000e+00 : f32
    %15 = vector.broadcast %cst_9 : f32 to vector<16x64xf32>
    %16 = arith.addf %15, %14 : vector<16x64xf32>
    %17 = tpu.reciprocal %16 {approx = true} : vector<16x64xf32> -> vector<16x64xf32>
    %cst_10 = arith.constant 1.06140542 : f32
    %18 = vector.broadcast %cst_10 : f32 to vector<16x64xf32>
    %19 = arith.mulf %18, %17 : vector<16x64xf32>
    %cst_11 = arith.constant 1.45315206 : f32
    %20 = vector.broadcast %cst_11 : f32 to vector<16x64xf32>
    %21 = arith.subf %19, %20 : vector<16x64xf32>
    %22 = arith.mulf %21, %17 : vector<16x64xf32>
    %cst_12 = arith.constant 1.42141378 : f32
    %23 = vector.broadcast %cst_12 : f32 to vector<16x64xf32>
    %24 = arith.addf %22, %23 : vector<16x64xf32>
    %25 = arith.mulf %24, %17 : vector<16x64xf32>
    %cst_13 = arith.constant 0.284496725 : f32
    %26 = vector.broadcast %cst_13 : f32 to vector<16x64xf32>
    %27 = arith.subf %25, %26 : vector<16x64xf32>
    %28 = arith.mulf %27, %17 : vector<16x64xf32>
    %cst_14 = arith.constant 0.254829586 : f32
    %29 = vector.broadcast %cst_14 : f32 to vector<16x64xf32>
    %30 = arith.addf %28, %29 : vector<16x64xf32>
    %31 = arith.mulf %30, %17 : vector<16x64xf32>
    %cst_15 = arith.constant 0.000000e+00 : f32
    %32 = vector.broadcast %cst_15 : f32 to vector<16x64xf32>
    %33 = arith.subf %32, %12 : vector<16x64xf32>
    %34 = arith.mulf %33, %12 : vector<16x64xf32>
    %35 = math.exp %34 : vector<16x64xf32>
    %36 = arith.mulf %31, %35 : vector<16x64xf32>
    %cst_16 = arith.constant 1.000000e+00 : f32
    %37 = vector.broadcast %cst_16 : f32 to vector<16x64xf32>
    %38 = arith.subf %37, %36 : vector<16x64xf32>
    %cst_17 = arith.constant 0.000000e+00 : f32
    %39 = vector.broadcast %cst_17 : f32 to vector<16x64xf32>
    %40 = arith.cmpf oge, %9, %39 : vector<16x64xf32>
    %cst_18 = arith.constant 0.000000e+00 : f32
    %41 = vector.broadcast %cst_18 : f32 to vector<16x64xf32>
    %42 = arith.subf %41, %38 : vector<16x64xf32>
    %43 = arith.select %40, %38, %42 : vector<16x64xi1>, vector<16x64xf32>
    %cst_19 = arith.constant 1.000000e+00 : f32
    %44 = vector.broadcast %cst_19 : f32 to vector<16x64xf32>
    %45 = arith.addf %44, %43 : vector<16x64xf32>
    %46 = arith.mulf %7, %45 : vector<16x64xf32>
    %47 = arith.truncf %46 : vector<16x64xf32> to vector<16x64xbf16>
    %c0_20 = arith.constant 0 : index
    %c0_21 = arith.constant 0 : index
    %48 = vector.load %arg4[%c0_20, %c0_21] : memref<64x32xbf16, #tpu.memory_space<vmem>>, vector<64x32xbf16>
    %cst_22 = arith.constant dense<0.000000e+00> : vector<16x32xf32>
    %49 = tpu.matmul %47, %48, %cst_22 {dimension_numbers = #tpu.dot_dimension_numbers<[1], [0], [0], [1], [0, 0, 1, 1], [], []>} : vector<16x64xbf16>, vector<64x32xbf16>, vector<16x32xf32> -> vector<16x32xf32>
    %c0_23 = arith.constant 0 : index
    %c0_24 = arith.constant 0 : index
    %50 = vector.load %arg5[%c0_23, %c0_24] : memref<1x32xf32, #tpu.memory_space<vmem>>, vector<1x32xf32>
    %51 = vector.broadcast %50 : vector<1x32xf32> to vector<16x32xf32>
    %52 = arith.addf %49, %51 : vector<16x32xf32>
    %c0_25 = arith.constant 0 : index
    %c0_26 = arith.constant 0 : index
    %53 = vector.load %arg6[%c0_25, %c0_26] : memref<16x32xf32, #tpu.memory_space<vmem>>, vector<16x32xf32>
    tpu.vector_store %arg6[%c0_25, %c0_26], %52 {strides = array<i32>} : memref<16x32xf32, #tpu.memory_space<vmem>>, vector<16x32xf32>,
    return
  }
  func.func @transform_0(%arg0: i32) -> (i32, i32) {
    %c0_i32 = arith.constant 0 : i32
    %c0_i32_0 = arith.constant 0 : i32
    return %arg0, %c0_i32 : i32, i32
  }
  func.func @transform_1(%arg0: i32) -> (i32, i32) {
    %c0_i32 = arith.constant 0 : i32
    %c0_i32_0 = arith.constant 0 : i32
    %c0_i32_1 = arith.constant 0 : i32
    return %c0_i32, %c0_i32_0 : i32, i32
  }
  func.func @transform_2(%arg0: i32) -> (i32, i32) {
    %c0_i32 = arith.constant 0 : i32
    %c0_i32_0 = arith.constant 0 : i32
    %c0_i32_1 = arith.constant 0 : i32
    return %c0_i32, %c0_i32_0 : i32, i32
  }
  func.func @transform_3(%arg0: i32) -> (i32, i32) {
    %c0_i32 = arith.constant 0 : i32
    %c0_i32_0 = arith.constant 0 : i32
    %c0_i32_1 = arith.constant 0 : i32
    return %c0_i32, %c0_i32_0 : i32, i32
  }
  func.func @transform_4(%arg0: i32) -> (i32, i32) {
    %c0_i32 = arith.constant 0 : i32
    %c0_i32_0 = arith.constant 0 : i32
    %c0_i32_1 = arith.constant 0 : i32
    return %c0_i32, %c0_i32_0 : i32, i32
  }
  func.func @transform_5(%arg0: i32) -> (i32, i32) {
    %c0_i32 = arith.constant 0 : i32
    %c0_i32_0 = arith.constant 0 : i32
    return %arg0, %c0_i32 : i32, i32
  }
}

</mosaic_0001>

<bundles_post_ra>
// kernel: tpu_custom_call.1
= control target key start
LH: loop header
LB: loop body
LE: loop exit
PB: predicated region body
PF: predicated region fallthrough
CT: control target
= control target key end

     0   :  { %s346_s0 = inlined_call_operand.vmem [shape: bf16[16,32], index: 0, kind: input, shape index: {}]   ;;  %s347_s1 = inlined_call_operand.vmem [shape: bf16[32,64], index: 1, kind: input, shape index: {}]   ;;  %s348_s2 = inlined_call_operand.vmem [shape: f32[1,64], index: 2, kind: input, shape index: {}]   ;;  %s349_s3 = inlined_call_operand.vmem [shape: bf16[64,32], index: 3, kind: input, shape index: {}]   ;;  %s350_s4 = inlined_call_operand.vmem [shape: f32[1,32], index: 4, kind: input, shape index: {}]   ;;  %s351_s5 = inlined_call_operand.hbm [shape: f32[16,32], index: 5, kind: output, shape index: {}]  }
   0x1   :  { %v232_v0 = vld [vmem:[%s347_s1 + $0x8] sm:$0xff]  ;;  %v231_v1 = vld [vmem:[%s347_s1] sm:$0xff] }
   0x2   :  { %59 = vmatpush.bf16.msra.mxu0 %v232_v0 }
   0x3   :  { %10 = vsyncpa [#allocation3], 0  ;;  %v230_v2 = vld [vmem:[%s346_s0] sm:$0xff]  ;;  %vm49_vm0 = vcmask 261120   ;;  %v236_v12 = vld [vmem:[%s349_s3 + $0x18] sm:$0xff]  ;;  %vm158_vm3 = vcmask 523264  }
   0x4   :  { %v240_v3 = vld [vmem:[%s348_s2] ss:$0 sm:$0xff]  ;;  %166 = vmatpush.bf16.msra.mxu1 %v236_v12  ;;  %v235_v16 = vld [vmem:[%s349_s3 + $0x10] sm:$0xff]  ;;  %v234_v19 = vld [vmem:[%s349_s3 + $0x8] sm:$0xff]  ;;  %s276_s7 = smov [#allocation2]   ;;  %s184_s11 = sshll.u32 %s351_s5, 4  ;;  %s185_s11 = int_to_ptr.hbm [resolvable:$true] %s184_s11 }
   0x5   :  { %v233_v25 = vld [vmem:[%s349_s3] sm:$0xff]  ;;  %s182_s8 = sshll.u32 %s276_s7, 4  ;;  %s277_s12 = smov 128   ;;  %s183_s8 = int_to_ptr.vmem [resolvable:$true] %s182_s8 }
   0x6   :  { %60 = vmatpush.bf16.msra.mxu0 %v231_v1  ;;  %v241_v1 = vld [vmem:[%s350_s4] ss:$0 sm:$0xff]  ;;  %s278_s13 = smov 8  }
   0x8   :  { %167 = vmatpush.bf16.msra.mxu1 %v235_v16 }
   0x9   :  { %208 = vmatmul.msk.bf16.vlgmr.msra.gmra.mxu0 %vm49_vm0, %v230_v2 }
   0xc   :  { %168 = vmatpush.bf16.msra.mxu1 %v234_v19 }
  0x10   :  { %169 = vmatpush.bf16.msra.mxu1 %v233_v25 }
  0x86   :  { %v62_v4 = vpop.f32.mrf.mxu0 }
  0x87   :  { %v322_v5 = vadd.f32 %v240_v3, %v62_v4 }
  0x89   :  { %v69_v6 = vmul.f32 0.70710677, %v322_v5  ;;  %v67_v59 = vmul.f32 0.5, %v322_v5 }
  0x8b   :  { %v71_v7 = vsub.f32 0.0, %v69_v6  ;;  %vm111_vm1 = vcmp.ge.f32.partialorder %v69_v6, 0.0 }
  0x8d   :  { %v73_v8 = vmax.f32 %v69_v6, %v71_v7 }
  0x8e   :  { %v64_v9 = vpop.f32.mrf.mxu0 }
  0x8f   :  { %v75_v10 = vmul.f32 0.3275911, %v73_v8  ;;  %v65_v11 = vadd.f32 %v240_v3, %v64_v9  ;;  %v99_v21 = vsub.f32 0.0, %v73_v8 }
  0x91   :  { %v77_v13 = vadd.f32 1.0, %v75_v10  ;;  %v70_v14 = vmul.f32 0.70710677, %v65_v11  ;;  %v101_v26 = vmul.f32 %v99_v21, %v73_v8  ;;  %v68_v60 = vmul.f32 0.5, %v65_v11 }
  0x93   :  { %242 = vrcp.f32 %v77_v13  ;;  %v72_v15 = vsub.f32 0.0, %v70_v14  ;;  %v103_v30 = vmul.f32 1.442695, %v101_v26  ;;  %vm112_vm2 = vcmp.ge.f32.partialorder %v70_v14, 0.0 }
  0x95   :  { %v74_v17 = vmax.f32 %v70_v14, %v72_v15 }
  0x97   :  { %v76_v18 = vmul.f32 0.3275911, %v74_v17  ;;  %v100_v31 = vsub.f32 0.0, %v74_v17 }
  0x99   :  { %v243_v20 = vpop.eup %242  ;;  %v78_v22 = vadd.f32 1.0, %v76_v18  ;;  %v102_v36 = vmul.f32 %v100_v31, %v74_v17 }
  0x9a   :  { %v81_v23 = vmul.f32 1.0614054, %v243_v20 }
  0x9b   :  { %244 = vrcp.f32 %v78_v22  ;;  %v105_v41 = vmul.f32 1.442695, %v102_v36 }
  0x9c   :  { %v209_v24 = vadd.f32 -1.4531521, %v81_v23  ;;  %246 = vpow2.f32 %v103_v30 }
  0x9d   :  { %248 = vpow2.f32 %v105_v41 }
  0x9e   :  { %v85_v27 = vmul.f32 %v243_v20, %v209_v24 }
  0xa0   :  { %v87_v28 = vadd.f32 1.4214138, %v85_v27 }
  0xa1   :  { %v245_v29 = vpop.eup %244 }
  0xa2   :  { %v89_v32 = vmul.f32 %v243_v20, %v87_v28  ;;  %v82_v33 = vmul.f32 1.0614054, %v245_v29  ;;  %v247_v44 = vpop.eup %246 }
  0xa3   :  { %v249_v52 = vpop.eup %248 }
  0xa4   :  { %v211_v34 = vadd.f32 -0.28449672, %v89_v32  ;;  %v210_v35 = vadd.f32 -1.4531521, %v82_v33 }
  0xa6   :  { %v93_v37 = vmul.f32 %v243_v20, %v211_v34  ;;  %v86_v38 = vmul.f32 %v245_v29, %v210_v35 }
  0xa8   :  { %v95_v39 = vadd.f32 0.2548296, %v93_v37  ;;  %v88_v40 = vadd.f32 1.4214138, %v86_v38 }
  0xaa   :  { %v97_v42 = vmul.f32 %v243_v20, %v95_v39  ;;  %v90_v43 = vmul.f32 %v245_v29, %v88_v40 }
  0xac   :  { %v107_v45 = vmul.f32 %v247_v44, %v97_v42  ;;  %v212_v46 = vadd.f32 -0.28449672, %v90_v43 }
  0xae   :  { %v109_v47 = vsub.f32 1.0, %v107_v45  ;;  %v94_v48 = vmul.f32 %v245_v29, %v212_v46 }
  0xb0   :  { %v96_v49 = vadd.f32 0.2548296, %v94_v48  ;;  %v113_v50 = vsub.f32 0.0, %v109_v47 }
  0xb2   :  { %v98_v51 = vmul.f32 %v245_v29, %v96_v49  ;;  %v115_v54 = vsel %vm111_vm1, %v109_v47, %v113_v50 }
  0xb3   :  { %v117_v57 = vadd.f32 1.0, %v115_v54 }
  0xb4   :  { %v108_v53 = vmul.f32 %v249_v52, %v98_v51 }
  0xb5   :  { %v119_v62 = vmul.f32 %v117_v57, %v67_v59 }
  0xb6   :  { %v110_v55 = vsub.f32 1.0, %v108_v53 }
  0xb8   :  { %v114_v56 = vsub.f32 0.0, %v110_v55 }
  0xba   :  { %v116_v58 = vsel %vm112_vm2, %v110_v55, %v114_v56 }
  0xbb   :  { %v118_v61 = vadd.f32 1.0, %v116_v58 }
  0xbd   :  { %v120_v63 = vmul.f32 %v118_v61, %v68_v60 }
  0xbf   :  { %v121_v0 = vpack.c.bf16 %v120_v63, %v119_v62 }
  0xc1   :  { %229 = vmatmul.msk.bf16.vlgmr.msra.gmra.mxu1 %vm158_vm3, %v121_v0 }
 0x13e   :  { %v171_v2 = vpop.f32.mrf.mxu1 }
 0x13f   :  { %v172_v3 = vadd.f32 %v241_v1, %v171_v2 }
 0x141   :  { %176 = vst.msk [vmem:[#allocation2] sm:$0xff] %vm49_vm0, %v172_v3 }
 0x146   :  { %v173_v4 = vpop.f32.mrf.mxu1 }
 0x147   :  { %v174_v5 = vadd.f32 %v241_v1, %v173_v4 }
 0x149   :  { %177 = vst.msk [vmem:[#allocation2 + $0x8] sm:$0xff] %vm49_vm0, %v174_v5 }
 0x14a   :  { %190 = dma.vmem_to_hbm [thread:$0]  %s183_s8, 256, %s185_s11, [#allocation3], %s277_s12, %s277_s12, %s278_s13  }
 0x14b   :  { %274 = dma.done.wait [#allocation3], 256  }
 0x14c   :  { %275 = vsyncadd [#allocation3], 4294967040 }
 0x14d   :  { %195 = vsyncpa [#allocation3], 1 }

// kernel: tpu_custom_call.1
= control target key start
LH: loop header
LB: loop body
LE: loop exit
PB: predicated region body
PF: predicated region fallthrough
CT: control target
= control target key end

     0   :  { %s346_s0 = inlined_call_operand.vmem [shape: bf16[16,32], index: 0, kind: input, shape index: {}]   ;;  %s347_s1 = inlined_call_operand.vmem [shape: bf16[32,64], index: 1, kind: input, shape index: {}]   ;;  %s348_s2 = inlined_call_operand.vmem [shape: f32[1,64], index: 2, kind: input, shape index: {}]   ;;  %s349_s3 = inlined_call_operand.vmem [shape: bf16[64,32], index: 3, kind: input, shape index: {}]   ;;  %s350_s4 = inlined_call_operand.vmem [shape: f32[1,32], index: 4, kind: input, shape index: {}]   ;;  %s351_s5 = inlined_call_operand.hbm [shape: f32[16,32], index: 5, kind: output, shape index: {}]  }
   0x1   :  { %v232_v0 = vld [vmem:[%s347_s1 + $0x8] sm:$0xff]  ;;  %v231_v1 = vld [vmem:[%s347_s1] sm:$0xff] }
   0x2   :  { %59 = vmatpush.bf16.msra.mxu0 %v232_v0 }
   0x3   :  { %10 = vsyncpa [#allocation3], 0  ;;  %v230_v2 = vld [vmem:[%s346_s0] sm:$0xff]  ;;  %vm49_vm0 = vcmask 261120   ;;  %v236_v12 = vld [vmem:[%s349_s3 + $0x18] sm:$0xff]  ;;  %vm158_vm3 = vcmask 523264  }
   0x4   :  { %v240_v3 = vld [vmem:[%s348_s2] ss:$0 sm:$0xff]  ;;  %166 = vmatpush.bf16.msra.mxu1 %v236_v12  ;;  %v235_v16 = vld [vmem:[%s349_s3 + $0x10] sm:$0xff]  ;;  %v234_v19 = vld [vmem:[%s349_s3 + $0x8] sm:$0xff]  ;;  %s276_s7 = smov [#allocation2]   ;;  %s184_s11 = sshll.u32 %s351_s5, 4  ;;  %s185_s11 = int_to_ptr.hbm [resolvable:$true] %s184_s11 }
   0x5   :  { %v233_v25 = vld [vmem:[%s349_s3] sm:$0xff]  ;;  %s182_s8 = sshll.u32 %s276_s7, 4  ;;  %s277_s12 = smov 128   ;;  %s183_s8 = int_to_ptr.vmem [resolvable:$true] %s182_s8 }
   0x6   :  { %60 = vmatpush.bf16.msra.mxu0 %v231_v1  ;;  %v241_v1 = vld [vmem:[%s350_s4] ss:$0 sm:$0xff]  ;;  %s278_s13 = smov 8  }
   0x8   :  { %167 = vmatpush.bf16.msra.mxu1 %v235_v16 }
   0x9   :  { %208 = vmatmul.msk.bf16.vlgmr.msra.gmra.mxu0 %vm49_vm0, %v230_v2 }
   0xc   :  { %168 = vmatpush.bf16.msra.mxu1 %v234_v19 }
  0x10   :  { %169 = vmatpush.bf16.msra.mxu1 %v233_v25 }
  0x86   :  { %v62_v4 = vpop.f32.mrf.mxu0 }
  0x87   :  { %v322_v5 = vadd.f32 %v240_v3, %v62_v4 }
  0x89   :  { %v69_v6 = vmul.f32 0.70710677, %v322_v5  ;;  %v67_v59 = vmul.f32 0.5, %v322_v5 }
  0x8b   :  { %v71_v7 = vsub.f32 0.0, %v69_v6  ;;  %vm111_vm1 = vcmp.ge.f32.partialorder %v69_v6, 0.0 }
  0x8d   :  { %v73_v8 = vmax.f32 %v69_v6, %v71_v7 }
  0x8e   :  { %v64_v9 = vpop.f32.mrf.mxu0 }
  0x8f   :  { %v75_v10 = vmul.f32 0.3275911, %v73_v8  ;;  %v65_v11 = vadd.f32 %v240_v3, %v64_v9  ;;  %v99_v21 = vsub.f32 0.0, %v73_v8 }
  0x91   :  { %v77_v13 = vadd.f32 1.0, %v75_v10  ;;  %v70_v14 = vmul.f32 0.70710677, %v65_v11  ;;  %v101_v26 = vmul.f32 %v99_v21, %v73_v8  ;;  %v68_v60 = vmul.f32 0.5, %v65_v11 }
  0x93   :  { %242 = vrcp.f32 %v77_v13  ;;  %v72_v15 = vsub.f32 0.0, %v70_v14  ;;  %v103_v30 = vmul.f32 1.442695, %v101_v26  ;;  %vm112_vm2 = vcmp.ge.f32.partialorder %v70_v14, 0.0 }
  0x95   :  { %v74_v17 = vmax.f32 %v70_v14, %v72_v15 }
  0x97   :  { %v76_v18 = vmul.f32 0.3275911, %v74_v17  ;;  %v100_v31 = vsub.f32 0.0, %v74_v17 }
  0x99   :  { %v243_v20 = vpop.eup %242  ;;  %v78_v22 = vadd.f32 1.0, %v76_v18  ;;  %v102_v36 = vmul.f32 %v100_v31, %v74_v17 }
  0x9a   :  { %v81_v23 = vmul.f32 1.0614054, %v243_v20 }
  0x9b   :  { %244 = vrcp.f32 %v78_v22  ;;  %v105_v41 = vmul.f32 1.442695, %v102_v36 }
  0x9c   :  { %v209_v24 = vadd.f32 -1.4531521, %v81_v23  ;;  %246 = vpow2.f32 %v103_v30 }
  0x9d   :  { %248 = vpow2.f32 %v105_v41 }
  0x9e   :  { %v85_v27 = vmul.f32 %v243_v20, %v209_v24 }
  0xa0   :  { %v87_v28 = vadd.f32 1.4214138, %v85_v27 }
  0xa1   :  { %v245_v29 = vpop.eup %244 }
  0xa2   :  { %v89_v32 = vmul.f32 %v243_v20, %v87_v28  ;;  %v82_v33 = vmul.f32 1.0614054, %v245_v29  ;;  %v247_v44 = vpop.eup %246 }
  0xa3   :  { %v249_v52 = vpop.eup %248 }
  0xa4   :  { %v211_v34 = vadd.f32 -0.28449672, %v89_v32  ;;  %v210_v35 = vadd.f32 -1.4531521, %v82_v33 }
  0xa6   :  { %v93_v37 = vmul.f32 %v243_v20, %v211_v34  ;;  %v86_v38 = vmul.f32 %v245_v29, %v210_v35 }
  0xa8   :  { %v95_v39 = vadd.f32 0.2548296, %v93_v37  ;;  %v88_v40 = vadd.f32 1.4214138, %v86_v38 }
  0xaa   :  { %v97_v42 = vmul.f32 %v243_v20, %v95_v39  ;;  %v90_v43 = vmul.f32 %v245_v29, %v88_v40 }
  0xac   :  { %v107_v45 = vmul.f32 %v247_v44, %v97_v42  ;;  %v212_v46 = vadd.f32 -0.28449672, %v90_v43 }
  0xae   :  { %v109_v47 = vsub.f32 1.0, %v107_v45  ;;  %v94_v48 = vmul.f32 %v245_v29, %v212_v46 }
  0xb0   :  { %v96_v49 = vadd.f32 0.2548296, %v94_v48  ;;  %v113_v50 = vsub.f32 0.0, %v109_v47 }
  0xb2   :  { %v98_v51 = vmul.f32 %v245_v29, %v96_v49  ;;  %v115_v54 = vsel %vm111_vm1, %v109_v47, %v113_v50 }
  0xb3   :  { %v117_v57 = vadd.f32 1.0, %v115_v54 }
  0xb4   :  { %v108_v53 = vmul.f32 %v249_v52, %v98_v51 }
  0xb5   :  { %v119_v62 = vmul.f32 %v117_v57, %v67_v59 }
  0xb6   :  { %v110_v55 = vsub.f32 1.0, %v108_v53 }
  0xb8   :  { %v114_v56 = vsub.f32 0.0, %v110_v55 }
  0xba   :  { %v116_v58 = vsel %vm112_vm2, %v110_v55, %v114_v56 }
  0xbb   :  { %v118_v61 = vadd.f32 1.0, %v116_v58 }
  0xbd   :  { %v120_v63 = vmul.f32 %v118_v61, %v68_v60 }
  0xbf   :  { %v121_v0 = vpack.c.bf16 %v120_v63, %v119_v62 }
  0xc1   :  { %229 = vmatmul.msk.bf16.vlgmr.msra.gmra.mxu1 %vm158_vm3, %v121_v0 }
 0x13e   :  { %v171_v2 = vpop.f32.mrf.mxu1 }
 0x13f   :  { %v172_v3 = vadd.f32 %v241_v1, %v171_v2 }
 0x141   :  { %176 = vst.msk [vmem:[#allocation2] sm:$0xff] %vm49_vm0, %v172_v3 }
 0x146   :  { %v173_v4 = vpop.f32.mrf.mxu1 }
 0x147   :  { %v174_v5 = vadd.f32 %v241_v1, %v173_v4 }
 0x149   :  { %177 = vst.msk [vmem:[#allocation2 + $0x8] sm:$0xff] %vm49_vm0, %v174_v5 }
 0x14a   :  { %190 = dma.vmem_to_hbm [thread:$0]  %s183_s8, 256, %s185_s11, [#allocation3], %s277_s12, %s277_s12, %s278_s13  }
 0x14b   :  { %274 = dma.done.wait [#allocation3], 256  }
 0x14c   :  { %275 = vsyncadd [#allocation3], 4294967040 }
 0x14d   :  { %195 = vsyncpa [#allocation3], 1 }

</bundles_post_ra>
